<compile_context>
chip_gen: v5e
topology: v5e:2x2
jax: 0.10.0
libtpu: 0.0.40
codegen_flags: <defaults>
</compile_context>

<pallas_src>
import jax
import jax.numpy as jnp
from jax import lax
from jax.experimental import pallas as pl
from jax.experimental.pallas import tpu as pltpu


# ----------------------------- Pallas kernel --------------------------------
def _cond_embedder_kernel(x_ref, avg_ref, lnw_ref, lnb_ref,
                          w1_ref, b1_ref,
                          w2_ref, b2_ref,
                          w3_ref, b3_ref,
                          out_ref,
                          pad_a, pad_b):
    H, WC = x_ref.shape            # (H, W*C)    lane-dense row slabs
    WC2 = pad_b.shape[1]           # W * 2C
    eps = 1e-8

    # Zero only the halo rows of the padded scratch buffers; the interior rows
    # are fully rewritten before every read.
    pad_a[0:1, :] = jnp.zeros((1, WC), jnp.float32)
    pad_a[H + 1:H + 2, :] = jnp.zeros((1, WC), jnp.float32)
    pad_b[0:1, :] = jnp.zeros((1, WC2), jnp.float32)
    pad_b[H + 1:H + 2, :] = jnp.zeros((1, WC2), jnp.float32)

    x = x_ref[...]                                         # (H, W*C) f32

    # LayerNorm over the C channels of each pixel without leaving the
    # lane-dense layout: avg_ref is block-diagonal with 1/C blocks, so x @ avg
    # broadcasts each pixel's channel mean back onto its own C lanes.
    A = avg_ref[...]
    mean_b = jnp.dot(x, A, preferred_element_type=jnp.float32)
    xc = x - mean_b
    var_b = jnp.dot(xc * xc, A, preferred_element_type=jnp.float32)
    x_norm = xc * lax.rsqrt(var_b + eps)                   # self.norm (no affine)
    mod_in = x_norm * lnw_ref[...] + lnb_ref[...]          # modulation LN (affine)

    def conv3x3(pad_ref, interior, w_ref, b_ref):
        # 3x3 SAME conv = 3 banded bf16 matmuls over padded rows.
        pad_ref[1:H + 1, :] = interior
        acc = jnp.zeros((H, w_ref.shape[-1]), jnp.float32)
        for ky in range(3):
            acc = acc + jnp.dot(pad_ref[ky:ky + H, :].astype(jnp.bfloat16),
                                w_ref[ky],
                                preferred_element_type=jnp.float32)
        return acc + b_ref[...]

    # ---- modulation branch: LN(affine) -> conv(C->2C) -> SiLU -> conv(2C->2C)
    h1 = conv3x3(pad_a, mod_in, w1_ref, b1_ref)            # (H, W*2C)
    h1 = h1 * pl.reciprocal(1.0 + jnp.exp(-h1), approx=True)   # SiLU (EUP)
    mod = conv3x3(pad_b, h1, w2_ref, b2_ref)               # lanes: [shift | scale]
    shift = mod[:, :WC]
    scale = mod[:, WC:]

    # ---- apply modulation, then the output conv (C -> mid_channels) ---------
    y = x_norm * (scale + 1.0) + shift                     # (H, W*C)
    out = conv3x3(pad_a, y, w3_ref, b3_ref)                # pad_a reused
    out_ref[...] = out.astype(out_ref.dtype)               # lane-dense store


# --------------------------- host-side helpers ------------------------------
def _banded_conv_weight(w_hwio, W):
    """(3,3,Cin,Cout) HWIO conv weight -> (3, W*Cin, W*Cout) banded matrices.

    out_row(y) = sum_ky padded_row(y+ky) @ result[ky]; SAME padding in W is
    encoded by the band structure (out-of-range taps have no entries).
    """
    _, _, cin, cout = w_hwio.shape
    mats = []
    for ky in range(3):
        acc = jnp.zeros((W, cin, W, cout), jnp.float32)
        for kx in range(3):
            shift_eye = jnp.eye(W, W, k=1 - kx, dtype=jnp.float32)
            acc = acc + jnp.einsum("pq,io->piqo", shift_eye, w_hwio[ky, kx])
        mats.append(acc.reshape(W * cin, W * cout))
    return jnp.stack(mats, axis=0)


def conditional_embedder(x_nchw, params):
    """NCHW in, NCHW out, matching the PyTorch module."""
    x = jnp.transpose(x_nchw, (0, 2, 3, 1)).astype(jnp.float32)   # NCHW -> NHWC
    B, H, W, C = x.shape
    C2 = params["b1"].shape[-1]        # 2 * in_channels
    CM = params["b3"].shape[-1]        # mid_channels
    WC, WC2, WCM = W * C, W * C2, W * CM

    x_flat = x.reshape(B, H, WC)                                  # lane-dense rows

    # Per-pixel channel-averaging matrix for the LayerNorms.
    avg = jnp.kron(jnp.eye(W, dtype=jnp.float32),
                   jnp.full((C, C), 1.0 / C, dtype=jnp.float32))  # (WC, WC)
    lnw_f = jnp.tile(params["ln_w"].reshape(1, C), (1, W))
    lnb_f = jnp.tile(params["ln_b"].reshape(1, C), (1, W))

    # Banded conv weights (bf16 for the MXU) and per-row-tiled biases.
    w1b = _banded_conv_weight(params["w1"], W).astype(jnp.bfloat16)    # (3, WC, WC2)
    b1f = jnp.tile(params["b1"].reshape(1, C2), (1, W))
    # Fused shift/scale conv: output lanes are [shift rows | scale rows].
    w2b = jnp.concatenate([_banded_conv_weight(params["w2s"], W),
                           _banded_conv_weight(params["w2c"], W)],
                          axis=-1).astype(jnp.bfloat16)                # (3, WC2, 2*WC)
    b2f = jnp.concatenate([jnp.tile(params["b2s"].reshape(1, C), (1, W)),
                           jnp.tile(params["b2c"].reshape(1, C), (1, W))], axis=-1)
    w3b = _banded_conv_weight(params["w3"], W).astype(jnp.bfloat16)    # (3, WC, WCM)
    b3f = jnp.tile(params["b3"].reshape(1, CM), (1, W))

    def whole(shape):
        n = len(shape)
        return pl.BlockSpec(shape, lambda b: (0,) * n)

    out_flat = pl.pallas_call(
        _cond_embedder_kernel,
        out_shape=jax.ShapeDtypeStruct((B, H, WCM), jnp.float32),
        grid_spec=pltpu.PrefetchScalarGridSpec(
            num_scalar_prefetch=0,
            grid=(B,),                                     # one batch image per step
            in_specs=[
                pl.BlockSpec((None, H, WC), lambda b: (b, 0, 0)),
                whole(avg.shape), whole(lnw_f.shape), whole(lnb_f.shape),
                whole(w1b.shape), whole(b1f.shape),
                whole(w2b.shape), whole(b2f.shape),
                whole(w3b.shape), whole(b3f.shape),
            ],
            out_specs=pl.BlockSpec((None, H, WCM), lambda b: (b, 0, 0)),
            scratch_shapes=[
                pltpu.VMEM((H + 2, WC), jnp.float32),      # conv1 & conv3 input (reused)
                pltpu.VMEM((H + 2, WC2), jnp.float32),     # conv2 input
            ]),
        compiler_params=pltpu.CompilerParams(
            dimension_semantics=("parallel",)),
    )(x_flat, avg, lnw_f, lnb_f, w1b, b1f, w2b, b2f, w3b, b3f)

    out = out_flat.reshape(B, H, W, CM)
    return jnp.transpose(out, (0, 3, 1, 2))                # NHWC -> NCHW


# ---------------------- pure-JAX reference (for checking) --------------------
def _layer_norm_nhwc(v, w=None, b=None, eps=1e-8):
    m = jnp.mean(v, axis=-1, keepdims=True)
    var = jnp.mean(jnp.square(v - m), axis=-1, keepdims=True)
    vn = (v - m) * lax.rsqrt(var + eps)
    if w is not None:
        vn = vn * w + b
    return vn


def _conv3x3_ref(v, w, b):
    return lax.conv_general_dilated(
        v, w, window_strides=(1, 1), padding="SAME",
        dimension_numbers=("NHWC", "HWIO", "NHWC"),
        precision=lax.Precision.HIGHEST) + b


def conditional_embedder_reference(x_nchw, params):
    x = jnp.transpose(x_nchw, (0, 2, 3, 1)).astype(jnp.float32)
    C = x.shape[-1]
    m = _layer_norm_nhwc(x, params["ln_w"], params["ln_b"])
    h = _conv3x3_ref(m, params["w1"], params["b1"])
    h = h * jax.nn.sigmoid(h)
    w2 = jnp.concatenate([params["w2s"], params["w2c"]], axis=-1)
    b2 = jnp.concatenate([params["b2s"], params["b2c"]], axis=-1)
    h2 = _conv3x3_ref(h, w2, b2)
    shift, scale = h2[..., :C], h2[..., C:]
    y = _layer_norm_nhwc(x) * (scale + 1.0) + shift
    out = _conv3x3_ref(y, params["w3"], params["b3"])
    return jnp.transpose(out, (0, 3, 1, 2))


if __name__ == "__main__":
    B, C, H, W, MID = 2, 4, 16, 16, 8
    key = jax.random.PRNGKey(0)
    ks = jax.random.split(key, 11)
    x = jax.random.normal(ks[0], (B, C, H, W), jnp.float32)

    def rnd(k, shape, s=0.2):
        v = (s * jax.random.normal(k, shape)).astype(jnp.float32)
        # Make parameters exactly bf16-representable so the bf16 MXU path and
        # the f32 reference share identical weight values.
        return v.astype(jnp.bfloat16).astype(jnp.float32)

    # Deterministic synthetic parameters (module __init__ shapes).
    # Conv weights are stored in HWIO; the second modulation conv (2C -> 2C)
    # is pre-split into its shift/scale output halves.
    params = {
        "ln_w": (1.0 + rnd(ks[1], (1, C), 0.1)).astype(jnp.float32),
        "ln_b": rnd(ks[2], (1, C), 0.1),
        "w1":   rnd(ks[3], (3, 3, C, 2 * C)),
        "b1":   rnd(ks[4], (1, 2 * C), 0.1),
        "w2s":  rnd(ks[5], (3, 3, 2 * C, C)),
        "b2s":  rnd(ks[6], (1, C), 0.1),
        "w2c":  rnd(ks[7], (3, 3, 2 * C, C)),
        "b2c":  rnd(ks[8], (1, C), 0.1),
        "w3":   rnd(ks[9], (3, 3, C, MID)),
        "b3":   rnd(ks[10], (1, MID), 0.1),
    }

    out = conditional_embedder(x, params)
    out = jax.block_until_ready(out)
    assert out.shape == (B, MID, H, W), out.shape

    ref = conditional_embedder_reference(x, params)
    # The kernel runs its conv matmuls in bf16 (per perf review), so compare
    # with a tolerance normalized to the output scale.
    max_err = float(jnp.max(jnp.abs(out - ref)))
    ref_scale = float(jnp.max(jnp.abs(ref)))
    if max_err > 2.5e-2 * ref_scale + 1e-3:
        raise AssertionError(
            f"Pallas kernel does not match JAX reference: "
            f"max_abs_err={max_err:.4e}, ref_scale={ref_scale:.4e}")
    print("KERNEL_OK")
</pallas_src>

<mosaic_0001>
module attributes {stable_mosaic.version = 11 : i64} {
  func.func @_cond_embedder_kernel(%arg0: i32, %arg1: memref<1x16x64xf32, #tpu.memory_space<vmem>>, %arg2: memref<64x64xf32, #tpu.memory_space<vmem>>, %arg3: memref<1x64xf32, #tpu.memory_space<vmem>>, %arg4: memref<1x64xf32, #tpu.memory_space<vmem>>, %arg5: memref<3x64x128xbf16, #tpu.memory_space<vmem>>, %arg6: memref<1x128xf32, #tpu.memory_space<vmem>>, %arg7: memref<3x128x128xbf16, #tpu.memory_space<vmem>>, %arg8: memref<1x128xf32, #tpu.memory_space<vmem>>, %arg9: memref<3x64x128xbf16, #tpu.memory_space<vmem>>, %arg10: memref<1x128xf32, #tpu.memory_space<vmem>>, %arg11: memref<1x16x128xf32, #tpu.memory_space<vmem>>, %arg12: memref<18x64xf32, #tpu.memory_space<vmem>>, %arg13: memref<18x128xf32, #tpu.memory_space<vmem>>) attributes {dimension_semantics = [#tpu.dimension_semantics<parallel>], iteration_bounds = array<i64: 2>, scalar_prefetch = 0 : i64, scratch_operands = 2 : i64, tpu.core_type = #tpu.core_type<tc>, window_params = [{transform_indices = @transform_0, window_bounds = array<i64: 1, 16, 64>}, {pipeline_mode = #tpu.pipeline_mode<synchronous>, transform_indices = @transform_1, window_bounds = array<i64: 64, 64>}, {pipeline_mode = #tpu.pipeline_mode<synchronous>, transform_indices = @transform_2, window_bounds = array<i64: 1, 64>}, {pipeline_mode = #tpu.pipeline_mode<synchronous>, transform_indices = @transform_3, window_bounds = array<i64: 1, 64>}, {pipeline_mode = #tpu.pipeline_mode<synchronous>, transform_indices = @transform_4, window_bounds = array<i64: 3, 64, 128>}, {pipeline_mode = #tpu.pipeline_mode<synchronous>, transform_indices = @transform_5, window_bounds = array<i64: 1, 128>}, {pipeline_mode = #tpu.pipeline_mode<synchronous>, transform_indices = @transform_6, window_bounds = array<i64: 3, 128, 128>}, {pipeline_mode = #tpu.pipeline_mode<synchronous>, transform_indices = @transform_7, window_bounds = array<i64: 1, 128>}, {pipeline_mode = #tpu.pipeline_mode<synchronous>, transform_indices = @transform_8, window_bounds = array<i64: 3, 64, 128>}, {pipeline_mode = #tpu.pipeline_mode<synchronous>, transform_indices = @transform_9, window_bounds = array<i64: 1, 128>}, {transform_indices = @transform_10, window_bounds = array<i64: 1, 16, 128>}]} {
    %cst = arith.constant 0.000000e+00 : f32
    %0 = vector.broadcast %cst : f32 to vector<1x64xf32>
    %c0 = arith.constant 0 : index
    %c0_0 = arith.constant 0 : index
    %1 = vector.load %arg12[%c0, %c0_0] : memref<18x64xf32, #tpu.memory_space<vmem>>, vector<1x64xf32>
    tpu.vector_store %arg12[%c0, %c0_0], %0 {strides = array<i32>} : memref<18x64xf32, #tpu.memory_space<vmem>>, vector<1x64xf32>,
    %cst_1 = arith.constant 0.000000e+00 : f32
    %2 = vector.broadcast %cst_1 : f32 to vector<1x64xf32>
    %c17 = arith.constant 17 : index
    %c0_2 = arith.constant 0 : index
    %3 = vector.load %arg12[%c17, %c0_2] : memref<18x64xf32, #tpu.memory_space<vmem>>, vector<1x64xf32>
    tpu.vector_store %arg12[%c17, %c0_2], %2 {strides = array<i32>} : memref<18x64xf32, #tpu.memory_space<vmem>>, vector<1x64xf32>,
    %cst_3 = arith.constant 0.000000e+00 : f32
    %4 = vector.broadcast %cst_3 : f32 to vector<1x128xf32>
    %c0_4 = arith.constant 0 : index
    %c0_5 = arith.constant 0 : index
    %5 = vector.load %arg13[%c0_4, %c0_5] : memref<18x128xf32, #tpu.memory_space<vmem>>, vector<1x128xf32>
    tpu.vector_store %arg13[%c0_4, %c0_5], %4 {strides = array<i32>} : memref<18x128xf32, #tpu.memory_space<vmem>>, vector<1x128xf32>,
    %cst_6 = arith.constant 0.000000e+00 : f32
    %6 = vector.broadcast %cst_6 : f32 to vector<1x128xf32>
    %c17_7 = arith.constant 17 : index
    %c0_8 = arith.constant 0 : index
    %7 = vector.load %arg13[%c17_7, %c0_8] : memref<18x128xf32, #tpu.memory_space<vmem>>, vector<1x128xf32>
    tpu.vector_store %arg13[%c17_7, %c0_8], %6 {strides = array<i32>} : memref<18x128xf32, #tpu.memory_space<vmem>>, vector<1x128xf32>,
    %c0_9 = arith.constant 0 : index
    %c0_10 = arith.constant 0 : index
    %c0_11 = arith.constant 0 : index
    %8 = vector.load %arg1[%c0_9, %c0_10, %c0_11] : memref<1x16x64xf32, #tpu.memory_space<vmem>>, vector<1x16x64xf32>
    %9 = vector.shape_cast %8 : vector<1x16x64xf32> to vector<16x64xf32>
    %c0_12 = arith.constant 0 : index
    %c0_13 = arith.constant 0 : index
    %10 = vector.load %arg2[%c0_12, %c0_13] : memref<64x64xf32, #tpu.memory_space<vmem>>, vector<64x64xf32>
    %cst_14 = arith.constant dense<0.000000e+00> : vector<16x64xf32>
    %11 = tpu.matmul %9, %10, %cst_14 {dimension_numbers = #tpu.dot_dimension_numbers<[1], [0], [0], [1], [0, 0, 1, 1], [], []>} : vector<16x64xf32>, vector<64x64xf32>, vector<16x64xf32> -> vector<16x64xf32>
    %12 = arith.subf %9, %11 : vector<16x64xf32>
    %13 = arith.mulf %12, %12 : vector<16x64xf32>
    %cst_15 = arith.constant dense<0.000000e+00> : vector<16x64xf32>
    %14 = tpu.matmul %13, %10, %cst_15 {dimension_numbers = #tpu.dot_dimension_numbers<[1], [0], [0], [1], [0, 0, 1, 1], [], []>} : vector<16x64xf32>, vector<64x64xf32>, vector<16x64xf32> -> vector<16x64xf32>
    %cst_16 = arith.constant 9.99999993E-9 : f32
    %15 = vector.broadcast %cst_16 : f32 to vector<16x64xf32>
    %16 = arith.addf %14, %15 : vector<16x64xf32>
    %17 = math.rsqrt %16 : vector<16x64xf32>
    %18 = arith.mulf %12, %17 : vector<16x64xf32>
    %c0_17 = arith.constant 0 : index
    %c0_18 = arith.constant 0 : index
    %19 = vector.load %arg3[%c0_17, %c0_18] : memref<1x64xf32, #tpu.memory_space<vmem>>, vector<1x64xf32>
    %20 = vector.broadcast %19 : vector<1x64xf32> to vector<16x64xf32>
    %21 = arith.mulf %18, %20 : vector<16x64xf32>
    %c0_19 = arith.constant 0 : index
    %c0_20 = arith.constant 0 : index
    %22 = vector.load %arg4[%c0_19, %c0_20] : memref<1x64xf32, #tpu.memory_space<vmem>>, vector<1x64xf32>
    %23 = vector.broadcast %22 : vector<1x64xf32> to vector<16x64xf32>
    %24 = arith.addf %21, %23 : vector<16x64xf32>
    %c1 = arith.constant 1 : index
    %c0_21 = arith.constant 0 : index
    %25 = vector.load %arg12[%c1, %c0_21] : memref<18x64xf32, #tpu.memory_space<vmem>>, vector<16x64xf32>
    tpu.vector_store %arg12[%c1, %c0_21], %24 {strides = array<i32>} : memref<18x64xf32, #tpu.memory_space<vmem>>, vector<16x64xf32>,
    %cst_22 = arith.constant 0.000000e+00 : f32
    %26 = vector.broadcast %cst_22 : f32 to vector<16x128xf32>
    %c0_23 = arith.constant 0 : index
    %c0_24 = arith.constant 0 : index
    %27 = vector.load %arg12[%c0_23, %c0_24] : memref<18x64xf32, #tpu.memory_space<vmem>>, vector<16x64xf32>
    %28 = arith.truncf %27 : vector<16x64xf32> to vector<16x64xbf16>
    %c0_25 = arith.constant 0 : index
    %c0_26 = arith.constant 0 : index
    %c0_27 = arith.constant 0 : index
    %29 = vector.load %arg5[%c0_25, %c0_26, %c0_27] : memref<3x64x128xbf16, #tpu.memory_space<vmem>>, vector<1x64x128xbf16>
    %30 = vector.shape_cast %29 : vector<1x64x128xbf16> to vector<64x128xbf16>
    %cst_28 = arith.constant dense<0.000000e+00> : vector<16x128xf32>
    %31 = tpu.matmul %28, %30, %cst_28 {dimension_numbers = #tpu.dot_dimension_numbers<[1], [0], [0], [1], [0, 0, 1, 1], [], []>} : vector<16x64xbf16>, vector<64x128xbf16>, vector<16x128xf32> -> vector<16x128xf32>
    %32 = arith.addf %26, %31 : vector<16x128xf32>
    %c1_29 = arith.constant 1 : index
    %c0_30 = arith.constant 0 : index
    %33 = vector.load %arg12[%c1_29, %c0_30] : memref<18x64xf32, #tpu.memory_space<vmem>>, vector<16x64xf32>
    %34 = arith.truncf %33 : vector<16x64xf32> to vector<16x64xbf16>
    %c1_31 = arith.constant 1 : index
    %c0_32 = arith.constant 0 : index
    %c0_33 = arith.constant 0 : index
    %35 = vector.load %arg5[%c1_31, %c0_32, %c0_33] : memref<3x64x128xbf16, #tpu.memory_space<vmem>>, vector<1x64x128xbf16>
    %36 = vector.shape_cast %35 : vector<1x64x128xbf16> to vector<64x128xbf16>
    %cst_34 = arith.constant dense<0.000000e+00> : vector<16x128xf32>
    %37 = tpu.matmul %34, %36, %cst_34 {dimension_numbers = #tpu.dot_dimension_numbers<[1], [0], [0], [1], [0, 0, 1, 1], [], []>} : vector<16x64xbf16>, vector<64x128xbf16>, vector<16x128xf32> -> vector<16x128xf32>
    %38 = arith.addf %32, %37 : vector<16x128xf32>
    %c2 = arith.constant 2 : index
    %c0_35 = arith.constant 0 : index
    %39 = vector.load %arg12[%c2, %c0_35] : memref<18x64xf32, #tpu.memory_space<vmem>>, vector<16x64xf32>
    %40 = arith.truncf %39 : vector<16x64xf32> to vector<16x64xbf16>
    %c2_36 = arith.constant 2 : index
    %c0_37 = arith.constant 0 : index
    %c0_38 = arith.constant 0 : index
    %41 = vector.load %arg5[%c2_36, %c0_37, %c0_38] : memref<3x64x128xbf16, #tpu.memory_space<vmem>>, vector<1x64x128xbf16>
    %42 = vector.shape_cast %41 : vector<1x64x128xbf16> to vector<64x128xbf16>
    %cst_39 = arith.constant dense<0.000000e+00> : vector<16x128xf32>
    %43 = tpu.matmul %40, %42, %cst_39 {dimension_numbers = #tpu.dot_dimension_numbers<[1], [0], [0], [1], [0, 0, 1, 1], [], []>} : vector<16x64xbf16>, vector<64x128xbf16>, vector<16x128xf32> -> vector<16x128xf32>
    %44 = arith.addf %38, %43 : vector<16x128xf32>
    %c0_40 = arith.constant 0 : index
    %c0_41 = arith.constant 0 : index
    %45 = vector.load %arg6[%c0_40, %c0_41] : memref<1x128xf32, #tpu.memory_space<vmem>>, vector<1x128xf32>
    %46 = vector.broadcast %45 : vector<1x128xf32> to vector<16x128xf32>
    %47 = arith.addf %44, %46 : vector<16x128xf32>
    %cst_42 = arith.constant 0.000000e+00 : f32
    %48 = vector.broadcast %cst_42 : f32 to vector<16x128xf32>
    %49 = arith.subf %48, %47 : vector<16x128xf32>
    %50 = math.exp %49 : vector<16x128xf32>
    %cst_43 = arith.constant 1.000000e+00 : f32
    %51 = vector.broadcast %cst_43 : f32 to vector<16x128xf32>
    %52 = arith.addf %51, %50 : vector<16x128xf32>
    %53 = tpu.reciprocal %52 {approx = true} : vector<16x128xf32> -> vector<16x128xf32>
    %54 = arith.mulf %47, %53 : vector<16x128xf32>
    %c1_44 = arith.constant 1 : index
    %c0_45 = arith.constant 0 : index
    %55 = vector.load %arg13[%c1_44, %c0_45] : memref<18x128xf32, #tpu.memory_space<vmem>>, vector<16x128xf32>
    tpu.vector_store %arg13[%c1_44, %c0_45], %54 {strides = array<i32>} : memref<18x128xf32, #tpu.memory_space<vmem>>, vector<16x128xf32>,
    %cst_46 = arith.constant 0.000000e+00 : f32
    %56 = vector.broadcast %cst_46 : f32 to vector<16x128xf32>
    %c0_47 = arith.constant 0 : index
    %c0_48 = arith.constant 0 : index
    %57 = vector.load %arg13[%c0_47, %c0_48] : memref<18x128xf32, #tpu.memory_space<vmem>>, vector<16x128xf32>
    %58 = arith.truncf %57 : vector<16x128xf32> to vector<16x128xbf16>
    %c0_49 = arith.constant 0 : index
    %c0_50 = arith.constant 0 : index
    %c0_51 = arith.constant 0 : index
    %59 = vector.load %arg7[%c0_49, %c0_50, %c0_51] : memref<3x128x128xbf16, #tpu.memory_space<vmem>>, vector<1x128x128xbf16>
    %60 = vector.shape_cast %59 : vector<1x128x128xbf16> to vector<128x128xbf16>
    %cst_52 = arith.constant dense<0.000000e+00> : vector<16x128xf32>
    %61 = tpu.matmul %58, %60, %cst_52 {dimension_numbers = #tpu.dot_dimension_numbers<[1], [0], [0], [1], [0, 0, 1, 1], [], []>} : vector<16x128xbf16>, vector<128x128xbf16>, vector<16x128xf32> -> vector<16x128xf32>
    %62 = arith.addf %56, %61 : vector<16x128xf32>
    %c1_53 = arith.constant 1 : index
    %c0_54 = arith.constant 0 : index
    %63 = vector.load %arg13[%c1_53, %c0_54] : memref<18x128xf32, #tpu.memory_space<vmem>>, vector<16x128xf32>
    %64 = arith.truncf %63 : vector<16x128xf32> to vector<16x128xbf16>
    %c1_55 = arith.constant 1 : index
    %c0_56 = arith.constant 0 : index
    %c0_57 = arith.constant 0 : index
    %65 = vector.load %arg7[%c1_55, %c0_56, %c0_57] : memref<3x128x128xbf16, #tpu.memory_space<vmem>>, vector<1x128x128xbf16>
    %66 = vector.shape_cast %65 : vector<1x128x128xbf16> to vector<128x128xbf16>
    %cst_58 = arith.constant dense<0.000000e+00> : vector<16x128xf32>
    %67 = tpu.matmul %64, %66, %cst_58 {dimension_numbers = #tpu.dot_dimension_numbers<[1], [0], [0], [1], [0, 0, 1, 1], [], []>} : vector<16x128xbf16>, vector<128x128xbf16>, vector<16x128xf32> -> vector<16x128xf32>
    %68 = arith.addf %62, %67 : vector<16x128xf32>
    %c2_59 = arith.constant 2 : index
    %c0_60 = arith.constant 0 : index
    %69 = vector.load %arg13[%c2_59, %c0_60] : memref<18x128xf32, #tpu.memory_space<vmem>>, vector<16x128xf32>
    %70 = arith.truncf %69 : vector<16x128xf32> to vector<16x128xbf16>
    %c2_61 = arith.constant 2 : index
    %c0_62 = arith.constant 0 : index
    %c0_63 = arith.constant 0 : index
    %71 = vector.load %arg7[%c2_61, %c0_62, %c0_63] : memref<3x128x128xbf16, #tpu.memory_space<vmem>>, vector<1x128x128xbf16>
    %72 = vector.shape_cast %71 : vector<1x128x128xbf16> to vector<128x128xbf16>
    %cst_64 = arith.constant dense<0.000000e+00> : vector<16x128xf32>
    %73 = tpu.matmul %70, %72, %cst_64 {dimension_numbers = #tpu.dot_dimension_numbers<[1], [0], [0], [1], [0, 0, 1, 1], [], []>} : vector<16x128xbf16>, vector<128x128xbf16>, vector<16x128xf32> -> vector<16x128xf32>
    %74 = arith.addf %68, %73 : vector<16x128xf32>
    %c0_65 = arith.constant 0 : index
    %c0_66 = arith.constant 0 : index
    %75 = vector.load %arg8[%c0_65, %c0_66] : memref<1x128xf32, #tpu.memory_space<vmem>>, vector<1x128xf32>
    %76 = vector.broadcast %75 : vector<1x128xf32> to vector<16x128xf32>
    %77 = arith.addf %74, %76 : vector<16x128xf32>
    %78 = vector.extract_strided_slice %77 {offsets = [0, 0], sizes = [16, 64], strides = [1, 1]} : vector<16x128xf32> to vector<16x64xf32>
    %79 = vector.extract_strided_slice %77 {offsets = [0, 64], sizes = [16, 64], strides = [1, 1]} : vector<16x128xf32> to vector<16x64xf32>
    %cst_67 = arith.constant 1.000000e+00 : f32
    %80 = vector.broadcast %cst_67 : f32 to vector<16x64xf32>
    %81 = arith.addf %79, %80 : vector<16x64xf32>
    %82 = arith.mulf %18, %81 : vector<16x64xf32>
    %83 = arith.addf %82, %78 : vector<16x64xf32>
    %c1_68 = arith.constant 1 : index
    %c0_69 = arith.constant 0 : index
    %84 = vector.load %arg12[%c1_68, %c0_69] : memref<18x64xf32, #tpu.memory_space<vmem>>, vector<16x64xf32>
    tpu.vector_store %arg12[%c1_68, %c0_69], %83 {strides = array<i32>} : memref<18x64xf32, #tpu.memory_space<vmem>>, vector<16x64xf32>,
    %cst_70 = arith.constant 0.000000e+00 : f32
    %85 = vector.broadcast %cst_70 : f32 to vector<16x128xf32>
    %c0_71 = arith.constant 0 : index
    %c0_72 = arith.constant 0 : index
    %86 = vector.load %arg12[%c0_71, %c0_72] : memref<18x64xf32, #tpu.memory_space<vmem>>, vector<16x64xf32>
    %87 = arith.truncf %86 : vector<16x64xf32> to vector<16x64xbf16>
    %c0_73 = arith.constant 0 : index
    %c0_74 = arith.constant 0 : index
    %c0_75 = arith.constant 0 : index
    %88 = vector.load %arg9[%c0_73, %c0_74, %c0_75] : memref<3x64x128xbf16, #tpu.memory_space<vmem>>, vector<1x64x128xbf16>
    %89 = vector.shape_cast %88 : vector<1x64x128xbf16> to vector<64x128xbf16>
    %cst_76 = arith.constant dense<0.000000e+00> : vector<16x128xf32>
    %90 = tpu.matmul %87, %89, %cst_76 {dimension_numbers = #tpu.dot_dimension_numbers<[1], [0], [0], [1], [0, 0, 1, 1], [], []>} : vector<16x64xbf16>, vector<64x128xbf16>, vector<16x128xf32> -> vector<16x128xf32>
    %91 = arith.addf %85, %90 : vector<16x128xf32>
    %c1_77 = arith.constant 1 : index
    %c0_78 = arith.constant 0 : index
    %92 = vector.load %arg12[%c1_77, %c0_78] : memref<18x64xf32, #tpu.memory_space<vmem>>, vector<16x64xf32>
    %93 = arith.truncf %92 : vector<16x64xf32> to vector<16x64xbf16>
    %c1_79 = arith.constant 1 : index
    %c0_80 = arith.constant 0 : index
    %c0_81 = arith.constant 0 : index
    %94 = vector.load %arg9[%c1_79, %c0_80, %c0_81] : memref<3x64x128xbf16, #tpu.memory_space<vmem>>, vector<1x64x128xbf16>
    %95 = vector.shape_cast %94 : vector<1x64x128xbf16> to vector<64x128xbf16>
    %cst_82 = arith.constant dense<0.000000e+00> : vector<16x128xf32>
    %96 = tpu.matmul %93, %95, %cst_82 {dimension_numbers = #tpu.dot_dimension_numbers<[1], [0], [0], [1], [0, 0, 1, 1], [], []>} : vector<16x64xbf16>, vector<64x128xbf16>, vector<16x128xf32> -> vector<16x128xf32>
    %97 = arith.addf %91, %96 : vector<16x128xf32>
    %c2_83 = arith.constant 2 : index
    %c0_84 = arith.constant 0 : index
    %98 = vector.load %arg12[%c2_83, %c0_84] : memref<18x64xf32, #tpu.memory_space<vmem>>, vector<16x64xf32>
    %99 = arith.truncf %98 : vector<16x64xf32> to vector<16x64xbf16>
    %c2_85 = arith.constant 2 : index
    %c0_86 = arith.constant 0 : index
    %c0_87 = arith.constant 0 : index
    %100 = vector.load %arg9[%c2_85, %c0_86, %c0_87] : memref<3x64x128xbf16, #tpu.memory_space<vmem>>, vector<1x64x128xbf16>
    %101 = vector.shape_cast %100 : vector<1x64x128xbf16> to vector<64x128xbf16>
    %cst_88 = arith.constant dense<0.000000e+00> : vector<16x128xf32>
    %102 = tpu.matmul %99, %101, %cst_88 {dimension_numbers = #tpu.dot_dimension_numbers<[1], [0], [0], [1], [0, 0, 1, 1], [], []>} : vector<16x64xbf16>, vector<64x128xbf16>, vector<16x128xf32> -> vector<16x128xf32>
    %103 = arith.addf %97, %102 : vector<16x128xf32>
    %c0_89 = arith.constant 0 : index
    %c0_90 = arith.constant 0 : index
    %104 = vector.load %arg10[%c0_89, %c0_90] : memref<1x128xf32, #tpu.memory_space<vmem>>, vector<1x128xf32>
    %105 = vector.broadcast %104 : vector<1x128xf32> to vector<16x128xf32>
    %106 = arith.addf %103, %105 : vector<16x128xf32>
    %c0_91 = arith.constant 0 : index
    %c0_92 = arith.constant 0 : index
    %c0_93 = arith.constant 0 : index
    %107 = vector.load %arg11[%c0_91, %c0_92, %c0_93] : memref<1x16x128xf32, #tpu.memory_space<vmem>>, vector<1x16x128xf32>
    %108 = vector.shape_cast %107 : vector<1x16x128xf32> to vector<16x128xf32>
    %109 = vector.shape_cast %106 : vector<16x128xf32> to vector<1x16x128xf32>
    tpu.vector_store %arg11[%c0_91, %c0_92, %c0_93], %109 {strides = array<i32>} : memref<1x16x128xf32, #tpu.memory_space<vmem>>, vector<1x16x128xf32>,
    return
  }
  func.func @transform_0(%arg0: i32) -> (i32, i32, i32) {
    %c0_i32 = arith.constant 0 : i32
    %c0_i32_0 = arith.constant 0 : i32
    %c0_i32_1 = arith.constant 0 : i32
    return %arg0, %c0_i32, %c0_i32_0 : i32, i32, i32
  }
  func.func @transform_1(%arg0: i32) -> (i32, i32) {
    %c0_i32 = arith.constant 0 : i32
    %c0_i32_0 = arith.constant 0 : i32
    %c0_i32_1 = arith.constant 0 : i32
    return %c0_i32, %c0_i32_0 : i32, i32
  }
  func.func @transform_2(%arg0: i32) -> (i32, i32) {
    %c0_i32 = arith.constant 0 : i32
    %c0_i32_0 = arith.constant 0 : i32
    %c0_i32_1 = arith.constant 0 : i32
    return %c0_i32, %c0_i32_0 : i32, i32
  }
  func.func @transform_3(%arg0: i32) -> (i32, i32) {
    %c0_i32 = arith.constant 0 : i32
    %c0_i32_0 = arith.constant 0 : i32
    %c0_i32_1 = arith.constant 0 : i32
    return %c0_i32, %c0_i32_0 : i32, i32
  }
  func.func @transform_4(%arg0: i32) -> (i32, i32, i32) {
    %c0_i32 = arith.constant 0 : i32
    %c0_i32_0 = arith.constant 0 : i32
    %c0_i32_1 = arith.constant 0 : i32
    %c0_i32_2 = arith.constant 0 : i32
    return %c0_i32, %c0_i32_0, %c0_i32_1 : i32, i32, i32
  }
  func.func @transform_5(%arg0: i32) -> (i32, i32) {
    %c0_i32 = arith.constant 0 : i32
    %c0_i32_0 = arith.constant 0 : i32
    %c0_i32_1 = arith.constant 0 : i32
    return %c0_i32, %c0_i32_0 : i32, i32
  }
  func.func @transform_6(%arg0: i32) -> (i32, i32, i32) {
    %c0_i32 = arith.constant 0 : i32
    %c0_i32_0 = arith.constant 0 : i32
    %c0_i32_1 = arith.constant 0 : i32
    %c0_i32_2 = arith.constant 0 : i32
    return %c0_i32, %c0_i32_0, %c0_i32_1 : i32, i32, i32
  }
  func.func @transform_7(%arg0: i32) -> (i32, i32) {
    %c0_i32 = arith.constant 0 : i32
    %c0_i32_0 = arith.constant 0 : i32
    %c0_i32_1 = arith.constant 0 : i32
    return %c0_i32, %c0_i32_0 : i32, i32
  }
  func.func @transform_8(%arg0: i32) -> (i32, i32, i32) {
    %c0_i32 = arith.constant 0 : i32
    %c0_i32_0 = arith.constant 0 : i32
    %c0_i32_1 = arith.constant 0 : i32
    %c0_i32_2 = arith.constant 0 : i32
    return %c0_i32, %c0_i32_0, %c0_i32_1 : i32, i32, i32
  }
  func.func @transform_9(%arg0: i32) -> (i32, i32) {
    %c0_i32 = arith.constant 0 : i32
    %c0_i32_0 = arith.constant 0 : i32
    %c0_i32_1 = arith.constant 0 : i32
    return %c0_i32, %c0_i32_0 : i32, i32
  }
  func.func @transform_10(%arg0: i32) -> (i32, i32, i32) {
    %c0_i32 = arith.constant 0 : i32
    %c0_i32_0 = arith.constant 0 : i32
    %c0_i32_1 = arith.constant 0 : i32
    return %arg0, %c0_i32, %c0_i32_0 : i32, i32, i32
  }
}

</mosaic_0001>

<bundles_post_ra>
// kernel: tpu_custom_call.1
= control target key start
LH: loop header
LB: loop body
LE: loop exit
PB: predicated region body
PF: predicated region fallthrough
CT: control target
= control target key end

     0   :  { %s2203_s0 = inlined_call_operand.hbm [shape: f32[2,16,64], index: 0, kind: input, shape index: {}]   ;;  %s2204_s1 = inlined_call_operand.hbm [shape: f32[64,64], index: 1, kind: input, shape index: {}]   ;;  %s2205_s2 = inlined_call_operand.vmem [shape: f32[1,64], index: 2, kind: input, shape index: {}]   ;;  %s2206_s3 = inlined_call_operand.vmem [shape: f32[1,64], index: 3, kind: input, shape index: {}]   ;;  %s2207_s4 = inlined_call_operand.hbm [shape: bf16[3,64,128], index: 4, kind: input, shape index: {}]   ;;  %s2208_s5 = inlined_call_operand.vmem [shape: f32[1,128], index: 5, kind: input, shape index: {}]   ;;  %s2209_s6 = inlined_call_operand.hbm [shape: bf16[3,128,128], index: 6, kind: input, shape index: {}]   ;;  %s2210_s7 = inlined_call_operand.vmem [shape: f32[1,128], index: 7, kind: input, shape index: {}]   ;;  %s2211_s8 = inlined_call_operand.hbm [shape: bf16[3,64,128], index: 8, kind: input, shape index: {}]   ;;  %s2212_s9 = inlined_call_operand.vmem [shape: f32[1,128], index: 9, kind: input, shape index: {}]   ;;  %s2213_s10 = inlined_call_operand.hbm [shape: f32[2,16,128], index: 10, kind: output, shape index: {}]  }
   0x1   :  { %2216 = sst [smem:[#allocation18_spill]] %s2204_s1 }
   0x2   :  { %2217 = sst [smem:[#allocation19_spill]] %s2207_s4 }
   0x3   :  { %2218 = sst [smem:[#allocation20_spill]] %s2209_s6 }
   0x4   :  { %2219 = sst [smem:[#allocation21_spill]] %s2211_s8 }
   0x5   :  { %15 = vsyncpa [#allocation5], 0 }
   0x6   :  { %17 = vsyncpa [#allocation5 + $0x1], 0 }
   0x7   :  { %18 = vsyncpa [#allocation8], 0 }
   0x8   :  { %19 = vsyncpa [#allocation11], 0 }
   0x9   :  { %20 = vsyncpa [#allocation6], 0 }
   0xa   :  { %22 = vsyncpa [#allocation6 + $0x1], 0  ;;  %s1984_s13 = smov 0   ;;  %s1986_s14 = smov 0  }
   0xb   :  { %s1988_s15 = smov 0   ;;  %s1990_s16 = smov 0  }
   0xc LB: > { %s2005_s17 = sadd.s32 4294967295, %s1915_s16   ;;  %s1305_s18 = sadd.s32 4294967294, %s1915_s16   ;;  %s1915_s16 = sphi %s1990_s16, %s2236_s16   ;;  %s1911_s15 = sphi %s1988_s15, %s2235_s15   ;;  %s1907_s14 = sphi %s1986_s14, %s2234_s14   ;;  %s1903_s13 = sphi %s1984_s13, %s2233_s13  }
   0xd   : > { %p48_p0 = scmp.ne.s32.totalorder %s1907_s14, %s1903_s13  ;;  %p49_p1 = scmp.eq.s32.totalorder %s2005_s17, 0 }
   0xe   : > { %p261_p2 = scmp.eq.s32.totalorder %s2005_s17, 1  ;;  %p267_p3 = scmp.eq.s32.totalorder %s1305_s18, 1 }
   0xf   : > { %p2014_p4 = por %p49_p1, %p48_p0  ;;  %p1306_p5 = scmp.ge.s32.totalorder %s1915_s16, 1 }
  0x10   : > { %p2019_p6 = por %p267_p3, %p48_p0  ;;  %p274_p7 = scmp.lt.s32.totalorder %s1915_s16, 3 }
  0x11   : > { %s2222_s1 = sld [smem:[#allocation18_spill]]  ;;  %s1917_s25 = smov [#allocation7]  }
  0x12   : > { %p2027_p8 = pnand %p1306_p5, %p274_p7  ;;  %s287_s26 = sshll.u32 %s1917_s25, 4  ;;  %s288_s26 = int_to_ptr.vmem [resolvable:$true] %s287_s26 }
  0x13   : > { %s2225_s6 = sld [smem:[#allocation20_spill]]  ;;  %s2214_s11 = smov 128  }
  0x14   : > { %p1599_p9 = pneg %p2027_p8  ;;  %s2215_s12 = smov 8  }
  0x15   : > { %s1920_s18 = smov [#allocation10]   ;;  %s2226_s4 = sld [smem:[#allocation19_spill]] }
  0x16   : > { %p2035_p10 = pnand %p1599_p9, %p49_p1  ;;  %s324_s21 = sshll.u32 %s1920_s18, 4  ;;  %s325_s21 = int_to_ptr.vmem [resolvable:$true] %s324_s21 }
  0x17   : > { %s285_s23 = sshll.u32 %s2222_s1, 4  ;;  %s1921_s28 = smov 64   ;;  %s286_s23 = int_to_ptr.hbm [resolvable:$true] %s285_s23 }
  0x18   : > { %1602 = dma.hbm_to_vmem [thread:$0]  (!%p2035_p10), %s286_s23, 1024, %s288_s26, [#allocation8], %s2214_s11, %s2214_s11, %s2215_s12  }
  0x19   : > { %s322_s30 = sshll.u32 %s2225_s6, 4  ;;  %s1922_s29 = smov 4   ;;  %s323_s30 = int_to_ptr.hbm [resolvable:$true] %s322_s30 }
  0x1a   : > { %1608 = dma.hbm_to_vmem [thread:$0]  (!%p2035_p10), %s323_s30, 3072, %s325_s21, [#allocation11], %s1921_s28, %s1921_s28, %s1922_s29  }
  0x1b   : > { %s305_s1 = sshll.u32 %s2226_s4, 4  ;;  %s2227_s8 = sld [smem:[#allocation21_spill]]  ;;  %s306_s1 = int_to_ptr.hbm [resolvable:$true] %s305_s1 }
  0x1c   : > { %s1923_s22 = smov [#allocation9]   ;;  %s1924_s11 = smov [#allocation12]  }
  0x1d   : > { %s307_s25 = sshll.u32 %s1923_s22, 4  ;;  %s341_s12 = sshll.u32 %s1924_s11, 4  ;;  %s308_s25 = int_to_ptr.vmem [resolvable:$true] %s307_s25  ;;  %s342_s12 = int_to_ptr.vmem [resolvable:$true] %s341_s12 }
  0x1e   : > { %1605 = dma.hbm_to_vmem [thread:$0]  (!%p2035_p10), %s306_s1, 1536, %s308_s25, [#allocation8], %s1921_s28, %s1921_s28, %s1922_s29  }
  0x1f   : > { %s2061_s30 = sadd.s32 1, %s1915_s16   ;;  %s35_s21 = sadd.s32 1, %s1911_s15 }
  0x20   : > { %s32_s23 = ssub.s32 %s1915_s16, %s2061_s30  ;;  %p42_p12 = scmp.ne.s32.totalorder %s1911_s15, %s1907_s14 }
  0x21   : > { %s339_s18 = sshll.u32 %s2227_s8, 4  ;;  %p33_p13 = scmp.eq.s32.totalorder %s32_s23, 0  ;;  %s340_s18 = int_to_ptr.hbm [resolvable:$true] %s339_s18 }
  0x22   : > { %1611 = dma.hbm_to_vmem [thread:$0]  (!%p2035_p10), %s340_s18, 1536, %s342_s12, [#allocation11], %s1921_s28, %s1921_s28, %s1922_s29  }
  0x23   : > { %p43_p0 = scmp.eq.s32.totalorder %s1915_s16, 0  ;;  %p2071_p3 = por %p261_p2, %p42_p12 }
  0x24   : > { %p1624_p5 = scmp.lt.s32.totalorder %s1915_s16, 2  ;;  %s358_s11 = sand.u32 1, %s1911_s15  }
  0x25   : > { %s2077_s1 = scalar_select %p33_p13, %s1911_s15, %s35_s21  }
  0x26   : > { %p44_p7 = por %p43_p0, %p42_p12  ;;  %s1312_s27 = sshll.u32 %s358_s11, 4 }
  0x27   : > { %s1529_s12 = sshll.u32 %s1915_s16, 4  ;;  %s362_s22 = scalar_lea.vmem [#allocation4], %s1312_s27 }
  0x28   : > { %s367_s18 = scalar_lea.hbm %s2203_s0, %s1529_s12  ;;  %s370_s25 = sshll.u32 %s362_s22, 4  ;;  %s371_s25 = int_to_ptr.vmem [resolvable:$true] %s370_s25 }
  0x29   : > { %s368_s23 = sshll.u32 %s367_s18, 4  ;;  %p2084_p2 = pnand %p1624_p5, %p44_p7  ;;  %s369_s23 = int_to_ptr.hbm [resolvable:$true] %s368_s23 }
  0x2a   : > { %s359_s21 = scalar_lea.sflag [#allocation5], %s358_s11  ;;  %s1811_s6 = sshra.s32 %s369_s23, 4  ;;  %s1812_s6 = int_to_ptr.hbm [resolvable:$true] %s1811_s6 }
  0x2b   : > { %s1813_s8 = scalar_lea.hbm %s1812_s6, 16  ;;  %p1815_p10 = pneg %p2084_p2 }
  0x2c   : > { %p1814_p9 = scmp.ne.s32.totalorder %s1812_s6, %s1813_s8  ;;  %s1818_s28 = scalar_lea.hbm %s2203_s0, 32 }
  0x2d   : > { %p1819_p0 = scmp.lt.s32.totalorder %s1812_s6, %s2203_s0  ;;  %p1820_p5 = scmp.lt.s32.totalorder %s1818_s28, %s1813_s8 }
  0x2e   : > { %p1816_p12 = pnand %p1815_p10, %p1814_p9 }
  0x2f   : > { %p1821_p7 = por %p1820_p5, %p1819_p0 }
  0x30   : > { %p1817_p13 = pneg %p1816_p12 }
  0x32   : > { %p1822_p11 = pnand %p1821_p7, %p1817_p13 }
  0x34   : > { %1825 = shalt.err (!%p1822_p11)
}
  0x35   : > { %s2230_s11 = smov 8   ;;  %s2231_s22 = smov 128  }
  0x36   : > { %1615 = dma.hbm_to_vmem [thread:$0]  (!%p2084_p2), %s369_s23, 256, %s371_s25, %s359_s21, %s2231_s22, %s2231_s22, %s2230_s11  }
  0x37   : > { %382 = sbr.rel (%p2027_p8) target bundleno = 997 (0x3e5), region = 60  ;;  %s2104_s12 = sand.u32 (!%p2027_p8), 1, %s1907_s14  }
  0x38   : > { %s1316_s6 = sshll.u32 (!%p2027_p8), %s2104_s12, 4  ;;  %s385_s8 = scalar_lea.sflag (!%p2027_p8), [#allocation5], %s2104_s12 }
  0x39   : > { %s2110_s27 = scalar_lea.vmem (!%p2027_p8), [#allocation4], %s1316_s6 }
  0x3c   : > { %1886 = dma.done.wait (%p2014_p4), %s385_s8, 256  }
  0x3d   : > { %1888 = vsyncadd (%p2014_p4), %s385_s8, 4294967040 }
  0x3e   : > { %1890 = dma.done.wait (%p49_p1), [#allocation8], 2560  }
  0x3f   : > { %1892 = vsyncadd (%p49_p1), [#allocation8], 4294964736 }
  0x40   : > { %1894 = dma.done.wait (%p49_p1), [#allocation11], 4608  }
  0x41   : > { %1896 = vsyncadd (%p49_p1), [#allocation11], 4294962688  ;;  %v461_v0 = vld [vmem:[#allocation7 + $0x38] sm:$0xff]  ;;  %v460_v1 = vld [vmem:[#allocation7 + $0x30] sm:$0xff]  ;;  %vm462_vm0 = vcmask 523264   ;;  %vm447_vm1 = vcmask 516096  }
  0x42   : > { %477 = vmatpush.msra.mxu0 %v461_v0  ;;  %510 = vmatpush.msra.mxu1 %v461_v0  ;;  %v459_v2 = vld [vmem:[#allocation7 + $0x28] sm:$0xff]  ;;  %v458_v3 = vld [vmem:[#allocation7 + $0x20] sm:$0xff]  ;;  %v457_v4 = vld [vmem:[#allocation7 + $0x18] sm:$0xff]  ;;  %v1925_v16 = vmov 0.0   ;;  %s1926_s18 = smov 64   ;;  %s1578_s8 = sshll.u32 %s2005_s17, 4 }
  0x43   : > { %v456_v5 = vld [vmem:[#allocation7 + $0x10] sm:$0xff]  ;;  %v455_v6 = vld [vmem:[#allocation7 + $0x8] sm:$0xff]  ;;  %v454_v7 = vld [vmem:[#allocation7] sm:$0xff]  ;;  %448 = vst.msk [vmem:[#allocation2] sm:$0x1] %vm447_vm1, %v1925_v16  ;;  %s1190_s19 = scalar_lea.hbm %s2213_s10, %s1578_s8  ;;  %s445_s24 = scalar_lea.vmem [#allocation13], %s1316_s6 }
  0x44   : > { %478 = vmatpush.msra.mxu0 %v460_v1  ;;  %511 = vmatpush.msra.mxu1 %v460_v1  ;;  %v452_v8 = vld [vmem:[%s2110_s27] sm:$0xff]  ;;  %v453_v9 = vld [vmem:[%s2110_s27 + $0x8] sm:$0xff]  ;;  %449 = vst.msk [vmem:[#allocation2 + $0x11] sm:$0x1] %vm447_vm1, %v1925_v16  ;;  %s1191_s25 = sshll.u32 %s445_s24, 4  ;;  %s1193_s23 = sshll.u32 %s1190_s19, 4  ;;  %s1192_s25 = int_to_ptr.vmem [resolvable:$true] %s1191_s25  ;;  %s1194_s23 = int_to_ptr.hbm [resolvable:$true] %s1193_s23 }
  0x45   : > { %v1537_v17 = vld [vmem:[#allocation9 + $0x38] sm:$0xff]  ;;  %450 = vst [vmem:[#allocation3] sm:$0x1] %v1925_v16  ;;  %v1536_v21 = vld [vmem:[#allocation9 + $0x30] sm:$0xff]  ;;  %v1535_v25 = vld [vmem:[#allocation9 + $0x28] sm:$0xff]  ;;  %s1179_s17 = scalar_lea.sflag [#allocation6], %s2104_s12 }
  0x46   : > { %479 = vmatpush.msra.mxu0 %v459_v2  ;;  %512 = vmatpush.msra.mxu1 %v459_v2  ;;  %v1533_v18 = vld [vmem:[#allocation9 + $0x18] sm:$0xff]  ;;  %451 = vst [vmem:[#allocation3 + $0x11] sm:$0x1] %v1925_v16  ;;  %v1532_v22 = vld [vmem:[#allocation9 + $0x10] sm:$0xff]  ;;  %v1531_v26 = vld [vmem:[#allocation9 + $0x8] sm:$0xff]  ;;  %s1855_s21 = sshra.s32 %s1194_s23, 4  ;;  %s1856_s21 = int_to_ptr.hbm [resolvable:$true] %s1855_s21 }
  0x47   : > { %v1541_v19 = vld [vmem:[#allocation9 + $0x58] sm:$0xff]  ;;  %615 = vmatpush.bf16.msra.mxu2 %v1537_v17  ;;  %656 = vmatpush.bf16.msra.mxu3 %v1533_v18  ;;  %v1540_v23 = vld [vmem:[#allocation9 + $0x50] sm:$0xff]  ;;  %v1539_v27 = vld [vmem:[#allocation9 + $0x48] sm:$0xff]  ;;  %s1857_s28 = scalar_lea.hbm %s1856_s21, 16  ;;  %p1862_p11 = scmp.lt.s32.totalorder %s1856_s21, %s2213_s10 }
  0x48   : > { %480 = vmatpush.msra.mxu0 %v458_v3  ;;  %513 = vmatpush.msra.mxu1 %v458_v3  ;;  %v1534_v28 = vld [vmem:[#allocation9 + $0x20] sm:$0xff]  ;;  %v1674_v41 = vld [vmem:[%s2205_s2] ss:$0 sm:$0xff]  ;;  %v1557_v0 = vld [vmem:[#allocation10 + $0x78] sm:$0xff]  ;;  %p1858_p1 = scmp.ne.s32.totalorder %s1856_s21, %s1857_s28 }
  0x49   : > { %v1530_v29 = vld [vmem:[#allocation9] sm:$0xff]  ;;  %v1675_v45 = vld [vmem:[%s2206_s3] ss:$0 sm:$0xff]  ;;  %v1549_v2 = vld [vmem:[#allocation10 + $0x38] sm:$0xff] }
  0x4a   : > { %481 = vmatpush.msra.mxu0 %v457_v4  ;;  %514 = vmatpush.msra.mxu1 %v457_v4  ;;  %v1538_v30 = vld [vmem:[#allocation9 + $0x40] sm:$0xff]  ;;  %v1556_v1 = vld [vmem:[#allocation10 + $0x70] sm:$0xff]  ;;  %v1565_v3 = vld [vmem:[#allocation10 + $0xb8] sm:$0xff]  ;;  %p1859_p4 = pnand %p1858_p1, %p2071_p3 }
  0x4b   : > { %616 = vmatpush.bf16.msra.mxu2 %v1536_v21  ;;  %657 = vmatpush.bf16.msra.mxu3 %v1532_v22  ;;  %v1555_v4 = vld [vmem:[#allocation10 + $0x68] sm:$0xff]  ;;  %v1561_v16 = vld [vmem:[#allocation10 + $0x98] sm:$0xff]  ;;  %v1676_v21 = vld [vmem:[%s2208_s5] ss:$0 sm:$0xff] }
  0x4c   : > { %482 = vmatpush.msra.mxu0 %v456_v5  ;;  %515 = vmatpush.msra.mxu1 %v456_v5  ;;  %v1548_v5 = vld [vmem:[#allocation10 + $0x30] sm:$0xff]  ;;  %v1551_v17 = vld [vmem:[#allocation10 + $0x48] sm:$0xff]  ;;  %p1860_p8 = pneg %p1859_p4 }
  0x4e   : > { %483 = vmatpush.msra.mxu0 %v455_v6  ;;  %516 = vmatpush.msra.mxu1 %v455_v6  ;;  %v1564_v6 = vld [vmem:[#allocation10 + $0xb0] sm:$0xff] }
  0x4f   : > { %617 = vmatpush.bf16.msra.mxu2 %v1535_v25  ;;  %658 = vmatpush.bf16.msra.mxu3 %v1531_v26  ;;  %v1550_v25 = vld [vmem:[#allocation10 + $0x40] sm:$0xff] }
  0x50   : > { %484 = vmatpush.msra.mxu0 %v454_v7  ;;  %517 = vmatpush.msra.mxu1 %v454_v7  ;;  %v1554_v7 = vld [vmem:[#allocation10 + $0x60] sm:$0xff] }
  0x51   : > { %1322 = vmatmul.msk.f32.vlgmr.msra.gmra.mxu0 %vm462_vm0, %v452_v8 }
  0x52   : > { %709 = vmatpush.bf16.msrb.mxu0 %v1541_v19  ;;  %828 = vmatpush.bf16.msrb.mxu1 %v1557_v0 }
  0x53   : > { %618 = vmatpush.bf16.msra.mxu2 %v1534_v28  ;;  %659 = vmatpush.bf16.msra.mxu3 %v1530_v29  ;;  %v1559_v28 = vld [vmem:[#allocation10 + $0x88] sm:$0xff] }
  0x56   : > { %710 = vmatpush.bf16.msrb.mxu0 %v1540_v23  ;;  %829 = vmatpush.bf16.msrb.mxu1 %v1556_v1  ;;  %v1544_v23 = vld [vmem:[#allocation10 + $0x10] sm:$0xff] }
  0x57   : > { %890 = vmatpush.bf16.msrb.mxu2 %v1549_v2  ;;  %972 = vmatpush.bf16.msrb.mxu3 %v1565_v3 }
  0x59   : > { %1323 = vmatmul.msk.f32.gmra.mxu0 %vm462_vm0, %v453_v9 }
  0x5a   : > { %711 = vmatpush.bf16.msrb.mxu0 %v1539_v27  ;;  %830 = vmatpush.bf16.msrb.mxu1 %v1555_v4  ;;  %v1543_v27 = vld [vmem:[#allocation10 + $0x8] sm:$0xff] }
  0x5b   : > { %891 = vmatpush.bf16.msrb.mxu2 %v1548_v5  ;;  %973 = vmatpush.bf16.msrb.mxu3 %v1564_v6 }
  0x5e   : > { %712 = vmatpush.bf16.msrb.mxu0 %v1538_v30  ;;  %831 = vmatpush.bf16.msrb.mxu1 %v1554_v7 }
  0xce   : > { %v486_v10 = vpop.f32.mrf.mxu0 }
  0xcf   : > { %v492_v11 = vsub.f32 %v452_v8, %v486_v10  ;;  %v1547_v8 = vld [vmem:[#allocation10 + $0x28] sm:$0xff]  ;;  %v1553_v10 = vld [vmem:[#allocation10 + $0x58] sm:$0xff] }
  0xd0   : > { %892 = vmatpush.bf16.msrb.mxu2 %v1547_v8  ;;  %832 = vmatpush.bf16.msrb.mxu1 %v1553_v10  ;;  %v1577_v10 = vld [vmem:[#allocation12 + $0x58] sm:$0xff] }
  0xd1   : > { %v494_v12 = vmul.f32 %v492_v11, %v492_v11 }
  0xd3   : > { %1324 = vmatmul.msk.f32.vlgmr.msra.gmra.mxu1 %vm462_vm0, %v494_v12  ;;  %v1562_v12 = vld [vmem:[#allocation10 + $0xa0] sm:$0xff] }
  0xd6   : > { %v489_v13 = vpop.f32.mrf.mxu0 }
  0xd7   : > { %v2129_v14 = vsub.f32 %v453_v9, %v489_v13  ;;  %v1563_v9 = vld [vmem:[#allocation10 + $0xa8] sm:$0xff]  ;;  %v1552_v13 = vld [vmem:[#allocation10 + $0x50] sm:$0xff] }
  0xd8   : > { %974 = vmatpush.bf16.msrb.mxu3 %v1563_v9  ;;  %833 = vmatpush.bf16.msrb.mxu1 %v1552_v13  ;;  %v1573_v9 = vld [vmem:[#allocation12 + $0x38] sm:$0xff]  ;;  %v1571_v13 = vld [vmem:[#allocation12 + $0x28] sm:$0xff] }
  0xd9   : > { %v495_v15 = vmul.f32 %v2129_v14, %v2129_v14  ;;  %1064 = vmatpush.bf16.msra.mxu0 %v1573_v9 }
  0xdb   : > { %1325 = vmatmul.msk.f32.gmra.mxu1 %vm462_vm0, %v495_v15  ;;  %v1545_v15 = vld [vmem:[#allocation10 + $0x18] sm:$0xff] }
  0xdc   : > { %975 = vmatpush.bf16.msrb.mxu3 %v1562_v12  ;;  %834 = vmatpush.bf16.msrb.mxu1 %v1551_v17  ;;  %v1576_v12 = vld [vmem:[#allocation12 + $0x50] sm:$0xff]  ;;  %v1569_v17 = vld [vmem:[#allocation12 + $0x18] sm:$0xff] }
  0xe0   : > { %976 = vmatpush.bf16.msrb.mxu3 %v1561_v16  ;;  %835 = vmatpush.bf16.msrb.mxu1 %v1550_v25  ;;  %v1574_v16 = vld [vmem:[#allocation12 + $0x40] sm:$0xff] }
  0xe4   : > { %1158 = vmatpush.bf16.msra.mxu1 %v1577_v10 }
  0xe8   : > { %1159 = vmatpush.bf16.msra.mxu1 %v1576_v12 }
 0x150   : > { %v519_v20 = vpop.f32.mrf.mxu1 }
 0x151   : > { %v520_v24 = vadd.f32 1e-08, %v519_v20 }
 0x153   : > { %1679 = vrsqrt.f32 %v520_v24  ;;  %vm531_vm3 = vweird.f32 %v520_v24 }
 0x158   : > { %v522_v31 = vpop.f32.mrf.mxu1 }
 0x159   : > { %v1680_v32 = vpop.eup %1679  ;;  %v523_v33 = vadd.f32 1e-08, %v522_v31 }
 0x15a   : > { %v526_v34 = vmul.f32 %v1680_v32, %v520_v24  ;;  %vm532_vm2 = vweird.f32 %v1680_v32  ;;  %v1560_v24 = vld [vmem:[#allocation10 + $0x90] sm:$0xff] }
 0x15b   : > { %1681 = vrsqrt.f32 %v523_v33  ;;  %vm533_vm4 = vmor %vm531_vm3, %vm532_vm2  ;;  %vm541_vm6 = vweird.f32 %v523_v33  ;;  %977 = vmatpush.bf16.msrb.mxu3 %v1560_v24 }
 0x15c   : > { %v527_v35 = vmul.f32 %v1680_v32, %v526_v34  ;;  %v1542_v34 = vld [vmem:[#allocation10] sm:$0xff] }
 0x15e   : > { %v528_v36 = vmul.f32 0.5, %v527_v35  ;;  %v1558_v35 = vld [vmem:[#allocation10 + $0x80] sm:$0xff] }
 0x15f   : > { %978 = vmatpush.bf16.msrb.mxu3 %v1559_v28 }
 0x160   : > { %v529_v37 = vsub.f32 1.5, %v528_v36 }
 0x161   : > { %v1682_v38 = vpop.eup %1681 }
 0x162   : > { %v530_v39 = vmul.f32 %v1680_v32, %v529_v37  ;;  %v536_v40 = vmul.f32 %v1682_v38, %v523_v33  ;;  %vm542_vm5 = vweird.f32 %v1682_v38 }
 0x163   : > { %vm543_vm7 = vmor %vm541_vm6, %vm542_vm5  ;;  %979 = vmatpush.bf16.msrb.mxu3 %v1558_v35 }
 0x164   : > { %v534_v42 = vsel %vm533_vm4, %v1680_v32, %v530_v39  ;;  %v537_v43 = vmul.f32 %v1682_v38, %v536_v40 }
 0x165   : > { %v2137_v44 = vmul.f32 %v534_v42, %v492_v11  ;;  %v1546_v11 = vld [vmem:[#allocation10 + $0x20] sm:$0xff] }
 0x166   : > { %v538_v46 = vmul.f32 0.5, %v537_v43  ;;  %893 = vmatpush.bf16.msrb.mxu2 %v1546_v11  ;;  %v1572_v11 = vld [vmem:[#allocation12 + $0x30] sm:$0xff] }
 0x167   : > { %v551_v47 = vmul.f32 %v1674_v41, %v2137_v44  ;;  %1065 = vmatpush.bf16.msra.mxu0 %v1572_v11 }
 0x168   : > { %v539_v48 = vsub.f32 1.5, %v538_v46 }
 0x169   : > { %v557_v49 = vadd.f32 %v1675_v45, %v551_v47 }
 0x16a   : > { %v540_v50 = vmul.f32 %v1682_v38, %v539_v48  ;;  %894 = vmatpush.bf16.msrb.mxu2 %v1545_v15  ;;  %v1570_v15 = vld [vmem:[#allocation12 + $0x20] sm:$0xff] }
 0x16b   : > { %559 = vst.msk [vmem:[#allocation2 + $0x1] sm:$0xff] %vm462_vm0, %v557_v49  ;;  %1066 = vmatpush.bf16.msra.mxu0 %v1571_v13 }
 0x16c   : > { %v544_v51 = vsel %vm543_vm7, %v1682_v38, %v540_v50 }
 0x16d   : > { %v2145_v52 = vmul.f32 %v544_v51, %v2129_v14 }
 0x16e   : > { %895 = vmatpush.bf16.msrb.mxu2 %v1544_v23 }
 0x16f   : > { %v552_v53 = vmul.f32 %v1674_v41, %v2145_v52  ;;  %1067 = vmatpush.bf16.msra.mxu0 %v1570_v15 }
 0x171   : > { %v558_v54 = vadd.f32 %v1675_v45, %v552_v53 }
 0x172   : > { %v572_v55 = vld [vmem:[#allocation2 + $0x1] sm:$0xff]  ;;  %896 = vmatpush.bf16.msrb.mxu2 %v1543_v27 }
 0x173   : > { %560 = vst.msk [vmem:[#allocation2 + $0x9] sm:$0xff] %vm462_vm0, %v558_v54  ;;  %v561_v56 = vld [vmem:[#allocation2] sm:$0xff] }
 0x176   : > { %897 = vmatpush.bf16.msrb.mxu2 %v1542_v34 }
 0x17a   : > { %v573_v57 = vld [vmem:[#allocation2 + $0x9] sm:$0xff] }
 0x17b   : > { %v562_v58 = vld [vmem:[#allocation2 + $0x8] sm:$0xff]  ;;  %v574_v60 = vpack.c.bf16 %v573_v57, %v572_v55 }
 0x17c   : > { %v666_v59 = vld [vmem:[#allocation2 + $0x2] sm:$0xff]  ;;  %v563_v61 = vpack.c.bf16 %v562_v58, %v561_v56  ;;  %v667_v62 = vld [vmem:[#allocation2 + $0xa] sm:$0xff] }
 0x17d   : > { %v668_v63 = vpack.c.bf16 %v667_v62, %v666_v59  ;;  %1342 = vmatmul.msk.bf16.vlgmr.msra.gmra.mxu2 %vm462_vm0, %v574_v60  ;;  %v1677_v62 = vld [vmem:[%s2210_s7] ss:$0 sm:$0xff] }
 0x17e   : > { %1359 = vmatmul.msk.bf16.vlgmr.msra.gmra.mxu3 %vm462_vm0, %v563_v61 }
 0x17f   : > { %1376 = vmatmul.msk.bf16.vlgmr.msrb.gmra.mxu0 %vm462_vm0, %v668_v63 }
 0x180   : > { %1105 = vmatpush.bf16.msrb.mxu0 %v1569_v17 }
 0x1fc   : > { %v714_v14 = vpop.f32.mrf.mxu0 }
 0x200   : > { %v620_v18 = vpop.f32.mrf.mxu2 }
 0x201   : > { %v661_v19 = vpop.f32.mrf.mxu3 }
 0x202   : > { %v662_v20 = vadd.f32 %v661_v19, %v620_v18  ;;  %v1568_v18 = vld [vmem:[#allocation12 + $0x10] sm:$0xff]  ;;  %v1567_v19 = vld [vmem:[#allocation12 + $0x8] sm:$0xff] }
 0x203   : > { %1106 = vmatpush.bf16.msrb.mxu0 %v1568_v18 }
 0x204   : > { %v719_v22 = vadd.f32 %v714_v14, %v662_v20  ;;  %v716_v36 = vpop.f32.mrf.mxu0  ;;  %v1575_v14 = vld [vmem:[#allocation12 + $0x48] sm:$0xff] }
 0x205   : > { %1160 = vmatpush.bf16.msra.mxu1 %v1575_v14 }
 0x206   : > { %v725_v26 = vadd.f32 %v1676_v21, %v719_v22  ;;  %v1566_v22 = vld [vmem:[#allocation12] sm:$0xff] }
 0x207   : > { %1107 = vmatpush.bf16.msrb.mxu0 %v1567_v19 }
 0x208   : > { %v727_v29 = vsub.f32 0.0, %v725_v26  ;;  %v622_v30 = vpop.f32.mrf.mxu2 }
 0x209   : > { %v663_v31 = vpop.f32.mrf.mxu3  ;;  %1161 = vmatpush.bf16.msra.mxu1 %v1574_v16 }
 0x20a   : > { %v729_v32 = vmul.f32 1.442695, %v727_v29  ;;  %v664_v33 = vadd.f32 %v663_v31, %v622_v30 }
 0x20b   : > { %1108 = vmatpush.bf16.msrb.mxu0 %v1566_v22 }
 0x20c   : > { %1683 = vpow2.f32 %v729_v32  ;;  %v720_v37 = vadd.f32 %v716_v36, %v664_v33 }
 0x20e   : > { %v726_v38 = vadd.f32 %v1676_v21, %v720_v37 }
 0x210   : > { %v728_v39 = vsub.f32 0.0, %v726_v38 }
 0x212   : > { %v1684_v40 = vpop.eup %1683  ;;  %v731_v41 = vmul.f32 1.442695, %v728_v39  ;;  %v1678_v39 = vld [vmem:[%s2212_s9] ss:$0 sm:$0xff] }
 0x213   : > { %v733_v42 = vadd.f32 1.0, %v1684_v40 }
 0x214   : > { %1685 = vpow2.f32 %v731_v41 }
 0x215   : > { %1687 = vrcp.f32 %v733_v42 }
 0x21a   : > { %v1686_v43 = vpop.eup %1685 }
 0x21b   : > { %v1688_v45 = vpop.eup %1687  ;;  %v734_v46 = vadd.f32 1.0, %v1686_v43 }
 0x21c   : > { %v737_v47 = vmul.f32 %v1688_v45, %v725_v26 }
 0x21d   : > { %1689 = vrcp.f32 %v734_v46 }
 0x21e   : > { %739 = vst [vmem:[#allocation3 + $0x1] sm:$0xff] %v737_v47 }
 0x223   : > { %v1690_v48 = vpop.eup %1689 }
 0x224   : > { %v738_v49 = vmul.f32 %v1690_v48, %v726_v38 }
 0x225   : > { %v741_v51 = vld [vmem:[#allocation3] sm:$0xff] }
 0x226   : > { %740 = vst [vmem:[#allocation3 + $0x9] sm:$0xff] %v738_v49  ;;  %v762_v50 = vpack.c.bf16 %v738_v49, %v737_v47 }
 0x228   : > { %836 = vmatmul.bf16.vlgmr.msrb.gmra.mxu1 %v762_v50 }
 0x22d   : > { %v742_v53 = vld [vmem:[#allocation3 + $0x8] sm:$0xff] }
 0x22e   : > { %v904_v54 = vld [vmem:[#allocation3 + $0x2] sm:$0xff]  ;;  %v905_v55 = vld [vmem:[#allocation3 + $0xa] sm:$0xff]  ;;  %v743_v56 = vpack.c.bf16 %v742_v53, %v741_v51 }
 0x22f   : > { %v906_v57 = vpack.c.bf16 %v905_v55, %v904_v54 }
 0x230   : > { %898 = vmatmul.bf16.vlgmr.msrb.gmra.mxu2 %v743_v56 }
 0x231   : > { %980 = vmatmul.bf16.vlgmr.msrb.gmra.mxu3 %v906_v57 }
 0x2a5   : > { %v837_v58 = vpop.f32.mrf.mxu1 }
 0x2ad   : > { %v839_v2 = vpop.f32.mrf.mxu1 }
 0x2b3   : > { %v899_v59 = vpop.f32.mrf.mxu2 }
 0x2b4   : > { %v981_v60 = vpop.f32.mrf.mxu3  ;;  %v900_v61 = vadd.f32 %v899_v59, %v837_v58 }
 0x2b6   : > { %v986_v63 = vadd.f32 %v981_v60, %v900_v61 }
 0x2b8   : > { %v992_v0 = vadd.f32 %v1677_v62, %v986_v63 }
 0x2ba   : > { %v994_v1 = vadd.f32 1.0, %v992_v0 }
 0x2bb   : > { %v901_v3 = vpop.f32.mrf.mxu2 }
 0x2bc   : > { %v902_v4 = vadd.f32 %v901_v3, %v839_v2  ;;  %998 = vrot.lane.b32.xlu0 %v994_v1, %s1926_s18  ;;  %v983_v5 = vpop.f32.mrf.mxu3 }
 0x2be   : > { %v987_v6 = vadd.f32 %v983_v5, %v902_v4 }
 0x2c0   : > { %v993_v7 = vadd.f32 %v1677_v62, %v987_v6 }
 0x2c2   : > { %v995_v8 = vadd.f32 1.0, %v993_v7 }
 0x2c4   : > { %1000 = vrot.lane.b32.xlu0 %v995_v8, %s1926_s18  ;;  %s1861_s18 = scalar_lea.hbm %s2213_s10, 32 }
 0x2c5   : > { %p1863_p2 = scmp.lt.s32.totalorder %s1861_s18, %s1857_s28 }
 0x2c7   : > { %p1864_p9 = por %p1863_p2, %p1862_p11 }
 0x2c9   : > { %p1865_p10 = pnand %p1864_p9, %p1860_p8 }
 0x32e   : > { %v999_v20 = vpop.permute.xlu0 %998 }
 0x32f   : > { %v1004_v21 = vmul.f32 %v999_v20, %v2137_v44 }
 0x331   : > { %v1006_v23 = vadd.f32 %v1004_v21, %v992_v0 }
 0x333   : > { %1008 = vst.msk [vmem:[#allocation2 + $0x1] sm:$0xff] %vm462_vm0, %v1006_v23 }
 0x336   : > { %v1001_v24 = vpop.permute.xlu0 %1000 }
 0x337   : > { %v1005_v25 = vmul.f32 %v1001_v24, %v2145_v52 }
 0x339   : > { %v1007_v26 = vadd.f32 %v1005_v25, %v993_v7 }
 0x33a   : > { %v1021_v27 = vld [vmem:[#allocation2 + $0x1] sm:$0xff] }
 0x33b   : > { %1009 = vst.msk [vmem:[#allocation2 + $0x9] sm:$0xff] %vm462_vm0, %v1007_v26  ;;  %v1010_v33 = vld [vmem:[#allocation2] sm:$0xff] }
 0x342   : > { %v1022_v28 = vld [vmem:[#allocation2 + $0x9] sm:$0xff] }
 0x343   : > { %v1115_v29 = vld [vmem:[#allocation2 + $0x2] sm:$0xff]  ;;  %v1116_v30 = vld [vmem:[#allocation2 + $0xa] sm:$0xff]  ;;  %v1023_v31 = vpack.c.bf16 %v1022_v28, %v1021_v27 }
 0x344   : > { %v1117_v32 = vpack.c.bf16 %v1116_v30, %v1115_v29  ;;  %v1011_v44 = vld [vmem:[#allocation2 + $0x8] sm:$0xff] }
 0x345   : > { %1489 = vmatmul.msk.bf16.vlgmr.msra.gmra.mxu0 %vm462_vm0, %v1023_v31  ;;  %v1012_v34 = vpack.c.bf16 %v1011_v44, %v1010_v33 }
 0x346   : > { %1523 = vmatmul.msk.bf16.vlgmr.msra.gmra.mxu1 %vm462_vm0, %v1117_v32 }
 0x355   : > { %1506 = vmatmul.msk.bf16.vlgmr.msrb.gmra.mxu0 %vm462_vm0, %v1012_v34 }
 0x3c2   : > { %v1069_v52 = vpop.f32.mrf.mxu0 }
 0x3c3   : > { %v1163_v36 = vpop.f32.mrf.mxu1 }
 0x3ca   : > { %v1071_v35 = vpop.f32.mrf.mxu0 }
 0x3cb   : > { %v1165_v45 = vpop.f32.mrf.mxu1 }
 0x3d2   : > { %v1110_v37 = vpop.f32.mrf.mxu0 }
 0x3d3   : > { %v1111_v38 = vadd.f32 %v1110_v37, %v1069_v52 }
 0x3d5   : > { %v1168_v40 = vadd.f32 %v1163_v36, %v1111_v38 }
 0x3d7   : > { %v1174_v41 = vadd.f32 %v1678_v39, %v1168_v40 }
 0x3d9   : > { %1176 = vst [vmem:[%s445_s24] sm:$0xff] %v1174_v41 }
 0x3da   : > { %v1112_v42 = vpop.f32.mrf.mxu0 }
 0x3db   : > { %v1113_v43 = vadd.f32 %v1112_v42, %v1071_v35 }
 0x3dd   : > { %v1169_v46 = vadd.f32 %v1165_v45, %v1113_v43 }
 0x3df   : > { %v1175_v47 = vadd.f32 %v1678_v39, %v1169_v46 }
 0x3e1   : > { %1177 = vst [vmem:[%s445_s24 + $0x8] sm:$0xff] %v1175_v47 }
 0x3e2   : > { %1868 = shalt.err (!%p1865_p10)
}
 0x3e3   : > { %s1927_s12 = smov 128   ;;  %s1928_s8 = smov 8  }
 0x3e4   : > { %1597 = dma.vmem_to_hbm [thread:$0]  (%p2071_p3), %s1192_s25, 256, %s1194_s23, %s1179_s17, %s1927_s12, %s1927_s12, %s1928_s8  }
 0x3e5 PF: > { %s1208_s27 = sand.u32 1, %s1903_s13   ;;  %p2232_p12 = scmp.ge.s32.totalorder %s1915_s16, 2 }
 0x3e6   : > { %s1209_s4 = scalar_lea.sflag [#allocation6], %s1208_s27 }
 0x3e7   : > { %p1617_p13 = pnand %p2232_p12, %p2019_p6 }
 0x3e9   : > { %p1618_p0 = pneg %p1617_p13 }
 0x3eb   : > { %1898 = dma.done.wait (%p1618_p0), %s1209_s4, 256  }
 0x3ec   : > { %1900 = vsyncadd (%p1618_p0), %s1209_s4, 4294967040  ;;  %p25_p5 = scmp.ge.s32.totalorder %s2061_s30, 4   ;;  %s2233_s13 = smov %s1907_s14 }
 0x3ed   : > { %s2234_s14 = smov %s1911_s15  ;;  %s2235_s15 = smov %s2077_s1 }
 0x3ee   : > { %s2236_s16 = smov %s2061_s30  ;;  %27 = sbr.rel (!%p25_p5) target bundleno = 12 (0xc), region = 127 }
 0x3f3   :  { %1215 = vsyncpa [#allocation5], 1 }
 0x3f4   :  { %1217 = vsyncpa [#allocation5 + $0x1], 1 }
 0x3f5   :  { %1218 = vsyncpa [#allocation8], 1 }
 0x3f6   :  { %1219 = vsyncpa [#allocation11], 1 }
 0x3f7   :  { %1220 = vsyncpa [#allocation6], 1 }
 0x3f8   :  { %1222 = vsyncpa [#allocation6 + $0x1], 1 }

</bundles_post_ra>
